<compile_context>
chip_gen: v7x
topology: tpu7x:2x2x1
jax: 0.10.0
libtpu: 0.0.40
codegen_flags: <defaults>
</compile_context>

<pallas_src>
import functools

import jax
import jax.numpy as jnp
from jax import lax
from jax.experimental import pallas as pl
from jax.experimental.pallas import tpu as pltpu

LN_EPS = 1e-5  # torch.nn.LayerNorm default eps


def _layer_norm(x, gamma, beta):
    """One-pass LayerNorm over the lane (hidden) axis, f32 accumulation."""
    x = x.astype(jnp.float32)
    inv_h = jnp.float32(1.0 / x.shape[-1])
    sx = jnp.sum(x, axis=-1, keepdims=True)
    sxx = jnp.sum(x * x, axis=-1, keepdims=True)
    mu = sx * inv_h
    var = sxx * inv_h - mu * mu
    xn = (x - mu) * lax.rsqrt(var + LN_EPS)
    return xn * gamma.astype(jnp.float32) + beta.astype(jnp.float32)


def _saue_kernel(w_ref, h_ref, c_ref, g_ref, b_ref, gc_ref, bc_ref,
                 out_ref, acc_ref, *, routed_layers):
    """One grid step == one (batch, seq-tile, routed-layer) triple.

    w_ref   : SMEM (1, Ltot) f32 -- precomputed aggregation weights
    h_ref   : VMEM (1, 1, TS, H) -- routed hidden states, layer `l` tile
    c_ref   : VMEM (1, TS, H)    -- cross-modal hidden states tile
    g_ref   : VMEM (1, 1, H)     -- LayerNorm weight for routed layer `l`
    b_ref   : VMEM (1, 1, H)     -- LayerNorm bias   for routed layer `l`
    gc_ref  : VMEM (1, 1, H)     -- LayerNorm weight for the cross-modal slot
    bc_ref  : VMEM (1, 1, H)     -- LayerNorm bias   for the cross-modal slot
    out_ref : VMEM (1, TS, H)    -- aggregated output tile
    acc_ref : VMEM (TS, H) f32   -- scratch accumulator (resident across `l`)
    """
    l = pl.program_id(2)

    y = _layer_norm(h_ref[0, 0], g_ref[0, 0], b_ref[0, 0])
    contrib = w_ref[0, l] * y

    @pl.when(l == 0)
    def _():
        acc_ref[...] = contrib  # init with first layer's contribution

    @pl.when(l > 0)
    def _():
        acc_ref[...] += contrib

    @pl.when(l == routed_layers - 1)
    def _():
        yc = _layer_norm(c_ref[0], gc_ref[0, 0], bc_ref[0, 0])
        w_cross = w_ref[0, routed_layers]
        out_ref[0] = (acc_ref[...] + w_cross * yc).astype(out_ref.dtype)


def manager_forward(hidden_states, cross_modal_hidden_states, masks,
                    ln_gamma, ln_beta, layer_scores, softmax_temperature,
                    *, routed_layers, seq_tile=None):
    """SAUE Manager forward (layer_index != 0, is_training=False).

    hidden_states            : (B, L, S, H)
    cross_modal_hidden_states: (B, S, H)
    masks                    : unused by the SAUE inference path
    ln_gamma / ln_beta       : (L+1, H)   stacked LayerNorm params
    layer_scores             : (L+1,)     flattened (1, L+1, 1, 1) parameter
    softmax_temperature      : (1,)
    returns                  : (B, S, H)
    """
    del masks  # SAUE.forward never uses masks (kept for signature parity)
    B, L, S, H = hidden_states.shape
    assert L == routed_layers
    Ltot = L + 1

    if seq_tile is None:
        # Largest power-of-two-ish tile that divides S, capped so that
        # double-buffered (TS, H) tiles stay small even on v7x's 64 MiB VMEM.
        seq_tile = S
        while seq_tile > 512 or (seq_tile > 8 and S % seq_tile != 0):
            seq_tile //= 2
    TS = seq_tile
    assert S % TS == 0

    # Precompute the aggregation weights once (batch/tile independent):
    # softmax over the routed scalar scores, raw score for the cross slot.
    scores = layer_scores.reshape(Ltot).astype(jnp.float32)
    temp = softmax_temperature.astype(jnp.float32)[0]
    w_routed = jax.nn.softmax(scores[:L] / temp)
    weights = jnp.concatenate([w_routed, scores[L:]]).reshape(1, Ltot)

    # Split LayerNorm params: per-routed-layer blocks + cross-modal block.
    g_routed = ln_gamma[:L].reshape(L, 1, H)
    b_routed = ln_beta[:L].reshape(L, 1, H)
    g_cross = ln_gamma[L:].reshape(1, 1, H)
    b_cross = ln_beta[L:].reshape(1, 1, H)

    kernel = functools.partial(_saue_kernel, routed_layers=L)

    return pl.pallas_call(
        kernel,
        out_shape=jax.ShapeDtypeStruct((B, S, H), hidden_states.dtype),
        grid=(B, S // TS, L),
        in_specs=[
            pl.BlockSpec(memory_space=pltpu.MemorySpace.SMEM),           # weights
            pl.BlockSpec((1, 1, TS, H), lambda b, s, l: (b, l, s, 0)),   # hidden
            pl.BlockSpec((1, TS, H), lambda b, s, l: (b, s, 0)),         # cross
            pl.BlockSpec((1, 1, H), lambda b, s, l: (l, 0, 0)),          # gamma routed
            pl.BlockSpec((1, 1, H), lambda b, s, l: (l, 0, 0)),          # beta routed
            pl.BlockSpec((1, 1, H), lambda b, s, l: (0, 0, 0)),          # gamma cross
            pl.BlockSpec((1, 1, H), lambda b, s, l: (0, 0, 0)),          # beta cross
        ],
        out_specs=pl.BlockSpec((1, TS, H), lambda b, s, l: (b, s, 0)),
        scratch_shapes=[pltpu.VMEM((TS, H), jnp.float32)],
        compiler_params=pltpu.CompilerParams(
            dimension_semantics=("parallel", "parallel", "arbitrary")),
    )(weights, hidden_states, cross_modal_hidden_states,
      g_routed, b_routed, g_cross, b_cross)


def _reference(hidden_states, cross, gamma, beta, scores, temp, routed_layers):
    """Pure-JAX reference mirroring SAUE.forward / aggregate_reps."""
    reps = jnp.concatenate([hidden_states, cross[:, None]], axis=1)

    def ln(x, g, b):
        mu = x.mean(-1, keepdims=True)
        var = ((x - mu) ** 2).mean(-1, keepdims=True)
        return (x - mu) / jnp.sqrt(var + LN_EPS) * g + b

    normed = jnp.stack(
        [ln(reps[:, i], gamma[i], beta[i]) for i in range(reps.shape[1])], axis=1)
    w_routed = jax.nn.softmax(scores[:routed_layers] / temp[0], axis=0)
    w = jnp.concatenate([w_routed, scores[routed_layers:]], axis=0)
    return jnp.sum(w[None, :, None, None] * normed, axis=1)


if __name__ == "__main__":
    # config: hidden_size=128, routed_layers=3, layer_index=1 (=> num_previous=1)
    # H=128 keeps the kernel output lane-dense; S=16 with TS=8 exercises the
    # sequence-tile grid axis.
    B, L, S, H = 2, 3, 16, 128
    Ltot = L + 1

    key = jax.random.PRNGKey(0)
    k_h, k_c, k_g, k_b = jax.random.split(key, 4)

    hidden_states = jax.random.normal(k_h, (B, L, S, H), jnp.float32)
    cross_modal_hidden_states = jax.random.normal(k_c, (B, S, H), jnp.float32)
    masks = jnp.ones((B, S), jnp.float32)  # unused by SAUE forward

    # Deterministic parameter init.  LayerNorm defaults are ones/zeros;
    # perturb deterministically so the affine path is exercised.
    ln_gamma = 1.0 + 0.1 * jax.random.normal(k_g, (Ltot, H), jnp.float32)
    ln_beta = 0.1 * jax.random.normal(k_b, (Ltot, H), jnp.float32)
    # layer_scores per SAUE.__init__: first L = 1/routed_layers, last = 1/num_previous
    layer_scores = jnp.concatenate(
        [jnp.full((L,), 1.0 / L, jnp.float32), jnp.ones((1,), jnp.float32)])
    softmax_temperature = jnp.ones((1,), jnp.float32)  # manager_softmax_temperature

    out = manager_forward(
        hidden_states, cross_modal_hidden_states, masks,
        ln_gamma, ln_beta, layer_scores, softmax_temperature,
        routed_layers=L, seq_tile=8)
    out = jax.block_until_ready(out)

    ref = _reference(hidden_states, cross_modal_hidden_states,
                     ln_gamma, ln_beta, layer_scores, softmax_temperature, L)
    assert out.shape == (B, S, H)
    # one-pass LN stats are f32-accumulated but slightly less stable than the
    # two-pass reference form -> compare at 1e-4.
    assert jnp.allclose(out, ref, atol=1e-4, rtol=1e-4), "mismatch vs reference"
    print("KERNEL_OK")
</pallas_src>

<mosaic_0001>
module attributes {stable_mosaic.version = 11 : i64} {
  func.func @_saue_kernel(%arg0: i32, %arg1: i32, %arg2: i32, %arg3: memref<1x4xf32, #tpu.memory_space<smem>>, %arg4: memref<1x1x8x128xf32, #tpu.memory_space<vmem>>, %arg5: memref<1x8x128xf32, #tpu.memory_space<vmem>>, %arg6: memref<1x1x128xf32, #tpu.memory_space<vmem>>, %arg7: memref<1x1x128xf32, #tpu.memory_space<vmem>>, %arg8: memref<1x1x128xf32, #tpu.memory_space<vmem>>, %arg9: memref<1x1x128xf32, #tpu.memory_space<vmem>>, %arg10: memref<1x8x128xf32, #tpu.memory_space<vmem>>, %arg11: memref<8x128xf32, #tpu.memory_space<vmem>>) attributes {dimension_semantics = [#tpu.dimension_semantics<parallel>, #tpu.dimension_semantics<parallel>, #tpu.dimension_semantics<arbitrary>], iteration_bounds = array<i64: 2, 2, 3>, scalar_prefetch = 0 : i64, scratch_operands = 1 : i64, tpu.core_type = #tpu.core_type<tc>, window_params = [{transform_indices = @transform_0, window_bounds = array<i64: 1, 4>}, {transform_indices = @transform_1, window_bounds = array<i64: 1, 1, 8, 128>}, {transform_indices = @transform_2, window_bounds = array<i64: 1, 8, 128>}, {transform_indices = @transform_3, window_bounds = array<i64: 1, 1, 128>}, {transform_indices = @transform_4, window_bounds = array<i64: 1, 1, 128>}, {pipeline_mode = #tpu.pipeline_mode<synchronous>, transform_indices = @transform_5, window_bounds = array<i64: 1, 1, 128>}, {pipeline_mode = #tpu.pipeline_mode<synchronous>, transform_indices = @transform_6, window_bounds = array<i64: 1, 1, 128>}, {transform_indices = @transform_7, window_bounds = array<i64: 1, 8, 128>}]} {
    %c0 = arith.constant 0 : index
    %c0_0 = arith.constant 0 : index
    %c0_1 = arith.constant 0 : index
    %c0_2 = arith.constant 0 : index
    %0 = vector.load %arg4[%c0, %c0_0, %c0_1, %c0_2] : memref<1x1x8x128xf32, #tpu.memory_space<vmem>>, vector<1x1x8x128xf32>
    %1 = vector.shape_cast %0 : vector<1x1x8x128xf32> to vector<8x128xf32>
    %c0_3 = arith.constant 0 : index
    %c0_4 = arith.constant 0 : index
    %c0_5 = arith.constant 0 : index
    %2 = vector.load %arg6[%c0_3, %c0_4, %c0_5] : memref<1x1x128xf32, #tpu.memory_space<vmem>>, vector<1x1x128xf32>
    %3 = vector.shape_cast %2 : vector<1x1x128xf32> to vector<128xf32>
    %c0_6 = arith.constant 0 : index
    %c0_7 = arith.constant 0 : index
    %c0_8 = arith.constant 0 : index
    %4 = vector.load %arg7[%c0_6, %c0_7, %c0_8] : memref<1x1x128xf32, #tpu.memory_space<vmem>>, vector<1x1x128xf32>
    %5 = vector.shape_cast %4 : vector<1x1x128xf32> to vector<128xf32>
    %cst = arith.constant dense<0.000000e+00> : vector<8xf32>
    %6 = vector.multi_reduction <add>, %1, %cst [1] : vector<8x128xf32> to vector<8xf32>
    %7 = vector.shape_cast %6 : vector<8xf32> to vector<8x1xf32>
    %8 = arith.mulf %1, %1 : vector<8x128xf32>
    %cst_9 = arith.constant dense<0.000000e+00> : vector<8xf32>
    %9 = vector.multi_reduction <add>, %8, %cst_9 [1] : vector<8x128xf32> to vector<8xf32>
    %10 = vector.shape_cast %9 : vector<8xf32> to vector<8x1xf32>
    %cst_10 = arith.constant 7.812500e-03 : f32
    %11 = vector.broadcast %cst_10 : f32 to vector<8x1xf32>
    %12 = arith.mulf %7, %11 : vector<8x1xf32>
    %cst_11 = arith.constant 7.812500e-03 : f32
    %13 = vector.broadcast %cst_11 : f32 to vector<8x1xf32>
    %14 = arith.mulf %10, %13 : vector<8x1xf32>
    %15 = arith.mulf %12, %12 : vector<8x1xf32>
    %16 = arith.subf %14, %15 : vector<8x1xf32>
    %17 = vector.broadcast %12 : vector<8x1xf32> to vector<8x128xf32>
    %18 = arith.subf %1, %17 : vector<8x128xf32>
    %cst_12 = arith.constant 9.99999974E-6 : f32
    %19 = vector.broadcast %cst_12 : f32 to vector<8x1xf32>
    %20 = arith.addf %16, %19 : vector<8x1xf32>
    %21 = math.rsqrt %20 : vector<8x1xf32>
    %22 = vector.broadcast %21 : vector<8x1xf32> to vector<8x128xf32>
    %23 = arith.mulf %18, %22 : vector<8x128xf32>
    %24 = vector.shape_cast %3 : vector<128xf32> to vector<1x128xf32>
    %25 = vector.broadcast %24 : vector<1x128xf32> to vector<8x128xf32>
    %26 = arith.mulf %23, %25 : vector<8x128xf32>
    %27 = vector.shape_cast %5 : vector<128xf32> to vector<1x128xf32>
    %28 = vector.broadcast %27 : vector<1x128xf32> to vector<8x128xf32>
    %29 = arith.addf %26, %28 : vector<8x128xf32>
    %c0_13 = arith.constant 0 : index
    %30 = arith.index_cast %arg2 : i32 to index
    %31 = memref.load %arg3[%c0_13, %30] : memref<1x4xf32, #tpu.memory_space<smem>>
    %32 = vector.broadcast %31 : f32 to vector<8x128xf32>
    %33 = arith.mulf %32, %29 : vector<8x128xf32>
    %c0_i32 = arith.constant 0 : i32
    %34 = arith.cmpi eq, %arg2, %c0_i32 : i32
    %35 = arith.extui %34 : i1 to i32
    %c0_i32_14 = arith.constant 0 : i32
    %36 = arith.cmpi ne, %35, %c0_i32_14 : i32
    scf.if %36 {
      %c0_18 = arith.constant 0 : index
      %c0_19 = arith.constant 0 : index
      %43 = vector.load %arg11[%c0_18, %c0_19] : memref<8x128xf32, #tpu.memory_space<vmem>>, vector<8x128xf32>
      tpu.vector_store %arg11[%c0_18, %c0_19], %33 {strides = array<i32>} : memref<8x128xf32, #tpu.memory_space<vmem>>, vector<8x128xf32>,
    } else {
    }
    %c0_i32_15 = arith.constant 0 : i32
    %37 = arith.cmpi sgt, %arg2, %c0_i32_15 : i32
    %38 = arith.extui %37 : i1 to i32
    %c0_i32_16 = arith.constant 0 : i32
    %39 = arith.cmpi ne, %38, %c0_i32_16 : i32
    scf.if %39 {
      %c0_18 = arith.constant 0 : index
      %c0_19 = arith.constant 0 : index
      %43 = vector.load %arg11[%c0_18, %c0_19] : memref<8x128xf32, #tpu.memory_space<vmem>>, vector<8x128xf32>
      %44 = arith.addf %43, %33 : vector<8x128xf32>
      %c0_20 = arith.constant 0 : index
      %c0_21 = arith.constant 0 : index
      %45 = vector.load %arg11[%c0_20, %c0_21] : memref<8x128xf32, #tpu.memory_space<vmem>>, vector<8x128xf32>
      tpu.vector_store %arg11[%c0_20, %c0_21], %44 {strides = array<i32>} : memref<8x128xf32, #tpu.memory_space<vmem>>, vector<8x128xf32>,
    } else {
    }
    %c2_i32 = arith.constant 2 : i32
    %40 = arith.cmpi eq, %arg2, %c2_i32 : i32
    %41 = arith.extui %40 : i1 to i32
    %c0_i32_17 = arith.constant 0 : i32
    %42 = arith.cmpi ne, %41, %c0_i32_17 : i32
    scf.if %42 {
      %c0_18 = arith.constant 0 : index
      %c0_19 = arith.constant 0 : index
      %c0_20 = arith.constant 0 : index
      %43 = vector.load %arg5[%c0_18, %c0_19, %c0_20] : memref<1x8x128xf32, #tpu.memory_space<vmem>>, vector<1x8x128xf32>
      %44 = vector.shape_cast %43 : vector<1x8x128xf32> to vector<8x128xf32>
      %c0_21 = arith.constant 0 : index
      %c0_22 = arith.constant 0 : index
      %c0_23 = arith.constant 0 : index
      %45 = vector.load %arg8[%c0_21, %c0_22, %c0_23] : memref<1x1x128xf32, #tpu.memory_space<vmem>>, vector<1x1x128xf32>
      %46 = vector.shape_cast %45 : vector<1x1x128xf32> to vector<128xf32>
      %c0_24 = arith.constant 0 : index
      %c0_25 = arith.constant 0 : index
      %c0_26 = arith.constant 0 : index
      %47 = vector.load %arg9[%c0_24, %c0_25, %c0_26] : memref<1x1x128xf32, #tpu.memory_space<vmem>>, vector<1x1x128xf32>
      %48 = vector.shape_cast %47 : vector<1x1x128xf32> to vector<128xf32>
      %cst_27 = arith.constant dense<0.000000e+00> : vector<8xf32>
      %49 = vector.multi_reduction <add>, %44, %cst_27 [1] : vector<8x128xf32> to vector<8xf32>
      %50 = vector.shape_cast %49 : vector<8xf32> to vector<8x1xf32>
      %51 = arith.mulf %44, %44 : vector<8x128xf32>
      %cst_28 = arith.constant dense<0.000000e+00> : vector<8xf32>
      %52 = vector.multi_reduction <add>, %51, %cst_28 [1] : vector<8x128xf32> to vector<8xf32>
      %53 = vector.shape_cast %52 : vector<8xf32> to vector<8x1xf32>
      %cst_29 = arith.constant 7.812500e-03 : f32
      %54 = vector.broadcast %cst_29 : f32 to vector<8x1xf32>
      %55 = arith.mulf %50, %54 : vector<8x1xf32>
      %cst_30 = arith.constant 7.812500e-03 : f32
      %56 = vector.broadcast %cst_30 : f32 to vector<8x1xf32>
      %57 = arith.mulf %53, %56 : vector<8x1xf32>
      %58 = arith.mulf %55, %55 : vector<8x1xf32>
      %59 = arith.subf %57, %58 : vector<8x1xf32>
      %60 = vector.broadcast %55 : vector<8x1xf32> to vector<8x128xf32>
      %61 = arith.subf %44, %60 : vector<8x128xf32>
      %cst_31 = arith.constant 9.99999974E-6 : f32
      %62 = vector.broadcast %cst_31 : f32 to vector<8x1xf32>
      %63 = arith.addf %59, %62 : vector<8x1xf32>
      %64 = math.rsqrt %63 : vector<8x1xf32>
      %65 = vector.broadcast %64 : vector<8x1xf32> to vector<8x128xf32>
      %66 = arith.mulf %61, %65 : vector<8x128xf32>
      %67 = vector.shape_cast %46 : vector<128xf32> to vector<1x128xf32>
      %68 = vector.broadcast %67 : vector<1x128xf32> to vector<8x128xf32>
      %69 = arith.mulf %66, %68 : vector<8x128xf32>
      %70 = vector.shape_cast %48 : vector<128xf32> to vector<1x128xf32>
      %71 = vector.broadcast %70 : vector<1x128xf32> to vector<8x128xf32>
      %72 = arith.addf %69, %71 : vector<8x128xf32>
      %c0_32 = arith.constant 0 : index
      %c3 = arith.constant 3 : index
      %73 = memref.load %arg3[%c0_32, %c3] : memref<1x4xf32, #tpu.memory_space<smem>>
      %c0_33 = arith.constant 0 : index
      %c0_34 = arith.constant 0 : index
      %74 = vector.load %arg11[%c0_33, %c0_34] : memref<8x128xf32, #tpu.memory_space<vmem>>, vector<8x128xf32>
      %75 = vector.broadcast %73 : f32 to vector<8x128xf32>
      %76 = arith.mulf %75, %72 : vector<8x128xf32>
      %77 = arith.addf %74, %76 : vector<8x128xf32>
      %c0_35 = arith.constant 0 : index
      %c0_36 = arith.constant 0 : index
      %c0_37 = arith.constant 0 : index
      %78 = vector.load %arg10[%c0_35, %c0_36, %c0_37] : memref<1x8x128xf32, #tpu.memory_space<vmem>>, vector<1x8x128xf32>
      %79 = vector.shape_cast %78 : vector<1x8x128xf32> to vector<8x128xf32>
      %80 = vector.shape_cast %77 : vector<8x128xf32> to vector<1x8x128xf32>
      tpu.vector_store %arg10[%c0_35, %c0_36, %c0_37], %80 {strides = array<i32>} : memref<1x8x128xf32, #tpu.memory_space<vmem>>, vector<1x8x128xf32>,
    } else {
    }
    return
  }
  func.func @transform_0(%arg0: i32, %arg1: i32, %arg2: i32) -> (i32, i32) {
    %c0_i32 = arith.constant 0 : i32
    %c0_i32_0 = arith.constant 0 : i32
    %c0_i32_1 = arith.constant 0 : i32
    return %c0_i32, %c0_i32_0 : i32, i32
  }
  func.func @transform_1(%arg0: i32, %arg1: i32, %arg2: i32) -> (i32, i32, i32, i32) {
    %c0_i32 = arith.constant 0 : i32
    %c0_i32_0 = arith.constant 0 : i32
    return %arg0, %arg2, %arg1, %c0_i32 : i32, i32, i32, i32
  }
  func.func @transform_2(%arg0: i32, %arg1: i32, %arg2: i32) -> (i32, i32, i32) {
    %c0_i32 = arith.constant 0 : i32
    %c0_i32_0 = arith.constant 0 : i32
    return %arg0, %arg1, %c0_i32 : i32, i32, i32
  }
  func.func @transform_3(%arg0: i32, %arg1: i32, %arg2: i32) -> (i32, i32, i32) {
    %c0_i32 = arith.constant 0 : i32
    %c0_i32_0 = arith.constant 0 : i32
    %c0_i32_1 = arith.constant 0 : i32
    return %arg2, %c0_i32, %c0_i32_0 : i32, i32, i32
  }
  func.func @transform_4(%arg0: i32, %arg1: i32, %arg2: i32) -> (i32, i32, i32) {
    %c0_i32 = arith.constant 0 : i32
    %c0_i32_0 = arith.constant 0 : i32
    %c0_i32_1 = arith.constant 0 : i32
    return %arg2, %c0_i32, %c0_i32_0 : i32, i32, i32
  }
  func.func @transform_5(%arg0: i32, %arg1: i32, %arg2: i32) -> (i32, i32, i32) {
    %c0_i32 = arith.constant 0 : i32
    %c0_i32_0 = arith.constant 0 : i32
    %c0_i32_1 = arith.constant 0 : i32
    %c0_i32_2 = arith.constant 0 : i32
    return %c0_i32, %c0_i32_0, %c0_i32_1 : i32, i32, i32
  }
  func.func @transform_6(%arg0: i32, %arg1: i32, %arg2: i32) -> (i32, i32, i32) {
    %c0_i32 = arith.constant 0 : i32
    %c0_i32_0 = arith.constant 0 : i32
    %c0_i32_1 = arith.constant 0 : i32
    %c0_i32_2 = arith.constant 0 : i32
    return %c0_i32, %c0_i32_0, %c0_i32_1 : i32, i32, i32
  }
  func.func @transform_7(%arg0: i32, %arg1: i32, %arg2: i32) -> (i32, i32, i32) {
    %c0_i32 = arith.constant 0 : i32
    %c0_i32_0 = arith.constant 0 : i32
    return %arg0, %arg1, %c0_i32 : i32, i32, i32
  }
}

</mosaic_0001>

<bundles_post_ra>
// kernel: tpu_custom_call.1
= control target key start
LH: loop header
LB: loop body
LE: loop exit
PB: predicated region body
PF: predicated region fallthrough
CT: control target
= control target key end

     0   :  { %s1464_s0 = inlined_call_operand.hbm [shape: f32[1,4], index: 0, kind: input, shape index: {}]   ;;  %s1465_s1 = inlined_call_operand.hbm [shape: f32[2,3,16,128], index: 1, kind: input, shape index: {}]   ;;  %s1466_s2 = inlined_call_operand.hbm [shape: f32[2,16,128], index: 2, kind: input, shape index: {}]   ;;  %s1467_s3 = inlined_call_operand.vmem [shape: f32[3,1,128], index: 3, kind: input, shape index: {}]   ;;  %s1468_s4 = inlined_call_operand.vmem [shape: f32[3,1,128], index: 4, kind: input, shape index: {}]   ;;  %s1469_s5 = inlined_call_operand.vmem [shape: f32[1,1,128], index: 5, kind: input, shape index: {}]   ;;  %s1470_s6 = inlined_call_operand.vmem [shape: f32[1,1,128], index: 6, kind: input, shape index: {}]   ;;  %s1471_s7 = inlined_call_operand.hbm [shape: f32[2,16,128], index: 7, kind: output, shape index: {}]  }
   0x1   :  { %1494 = sst [smem:[#allocation28_spill]] %s1464_s0 }
   0x2   :  { %1495 = sst [smem:[#allocation29_spill]] %s1467_s3 }
   0x3   :  { %1496 = sst [smem:[#allocation30_spill]] %s1468_s4 }
   0x4   :  { %1497 = sst [smem:[#allocation31_spill]] %s1469_s5 }
   0x5   :  { %1498 = sst [smem:[#allocation32_spill]] %s1470_s6 }
   0x6   :  { %1499 = sst [smem:[#allocation33_spill]] %s1471_s7 }
   0x7   :  { %12 = vsyncpa [#allocation6], 0 }
   0x8   :  { %13 = vsyncpa [#allocation4], 0 }
   0x9   :  { %15 = vsyncpa [#allocation4 + $0x1], 0 }
   0xa   :  { %16 = vsyncpa [#allocation9], 0 }
   0xb   :  { %18 = vsyncpa [#allocation9 + $0x1], 0 }
   0xc   :  { %19 = vsyncpa [#allocation5], 0 }
   0xd   :  { %21 = vsyncpa [#allocation5 + $0x1], 0  ;;  %s1086_s24 = smov 0   ;;  %s1088_s25 = smov 0  }
   0xe   :  { %s1090_s26 = smov 0   ;;  %s1092_s27 = smov 0  }
   0xf   :  { %s1094_s28 = smov 0   ;;  %s1096_s29 = smov 0  }
  0x10   :  { %s1098_s30 = smov 0   ;;  %s1100_s8 = smov 0  }
  0x11   :  { %s1102_s9 = smov 0   ;;  %s1104_s10 = smov 0  }
  0x12   :  { %s1106_s11 = smov 0   ;;  %s1108_s12 = smov 0  }
  0x13   :  { %s1110_s13 = smov 0  }
  0x14 LB: > { %1500 = sst [smem:[#allocation15_spill]] %s992_s24  ;;  %s653_s14 = sadd.s32 4294967295, %s1040_s13   ;;  %s1040_s13 = sphi %s1110_s13, %s27_s13   ;;  %s1036_s12 = sphi %s1108_s12, %s1566_s12   ;;  %s1032_s11 = sphi %s1106_s11, %s1565_s11   ;;  %s1028_s10 = sphi %s1104_s10, %s1554_s10   ;;  %s1024_s9 = sphi %s1102_s9, %s1564_s9   ;;  %s1020_s8 = sphi %s1100_s8, %s1563_s8   ;;  %s1016_s30 = sphi %s1098_s30, %s1553_s30   ;;  %s1012_s29 = sphi %s1096_s29, %s1562_s29   ;;  %s1008_s28 = sphi %s1094_s28, %s1561_s28   ;;  %s1004_s27 = sphi %s1092_s27, %s1560_s27   ;;  %s1000_s26 = sphi %s1090_s26, %s1559_s26   ;;  %s996_s25 = sphi %s1088_s25, %s1558_s25   ;;  %s992_s24 = sphi %s1086_s24, %s1557_s24  }
  0x15   : > { %1501 = sst [smem:[#allocation16_spill]] %s1008_s28  ;;  %s654_s15 = sadd.s32 4294967294, %s1040_s13  }
  0x16   : > { %1502 = sst [smem:[#allocation17_spill]] %s1016_s30  ;;  %p91_p0 = scmp.ne.s32.totalorder %s1008_s28, %s1004_s27 }
  0x17   : > { %1503 = sst [smem:[#allocation18_spill]] %s1020_s8  ;;  %p1152_p1 = scmp.eq.s32.totalorder %s653_s14, 0 }
  0x18   : > { %1504 = sst [smem:[#allocation19_spill]] %s1024_s9  ;;  %p119_p2 = scmp.ne.s32.totalorder %s996_s25, %s992_s24 }
  0x19   : > { %1505 = sst [smem:[#allocation20_spill]] %s1028_s10  ;;  %p1158_p3 = scmp.eq.s32.totalorder %s653_s14, 11 }
  0x1a   : > { %s1506_s16 = scalar_select %p1152_p1, 1, 0 }
  0x1b   : > { %s1508_s17 = scalar_select %p1158_p3, 1, 0 }
  0x1c   : > { %1507 = sst [smem:[#allocation21_spill]] %s1506_s16  ;;  %p1164_p4 = por %p1152_p1, %p91_p0 }
  0x1d   : > { %p245_p5 = scmp.eq.s32.totalorder %s654_s15, 11  ;;  %p1170_p6 = por %p119_p2, %p1152_p1 }
  0x1e   : > { %s1509_s18 = scalar_select %p1164_p4, 1, 0 }
  0x1f   : > { %s1511_s19 = scalar_select %p1170_p6, 1, 0 }
  0x20   : > { %1510 = sst [smem:[#allocation22_spill]] %s1509_s18  ;;  %p655_p7 = scmp.ge.s32.totalorder %s1040_s13, 1 }
  0x21   : > { %1512 = sst [smem:[#allocation23_spill]] %s1511_s19  ;;  %p1175_p8 = por %p245_p5, %p119_p2 }
  0x22   : > { %p252_p9 = scmp.lt.s32.totalorder %s1040_s13, 13  ;;  %s39_s22 = sadd.s32 1, %s1028_s10 }
  0x23   : > { %s1513_s20 = scalar_select %p1175_p8, 1, 0 }
  0x24   : > { %p1180_p10 = pnand %p655_p7, %p252_p9  ;;  %s1516_s0 = sld [smem:[#allocation28_spill]] }
  0x25   : > { %1514 = sst [smem:[#allocation24_spill]] %s1513_s20 }
  0x26   : > { %s1515_s21 = scalar_select %p1180_p10, 1, 0 }
  0x27   : > { %p693_p11 = pneg %p1180_p10 }
  0x29   : > { %p694_p12 = pnand %p693_p11, %p1152_p1 }
  0x2a   : > { %s821_s14 = scalar_lea.hbm %s1516_s0, 16 }
  0x2b   : > { %p822_p13 = scmp.ne.s32.totalorder %s1516_s0, %s821_s14  ;;  %p823_p0 = pneg %p694_p12 }
  0x2c   : > { %p828_p7 = scmp.lt.u32.totalorder %s821_s14, %s1516_s0 }
  0x2d   : > { %p824_p2 = pnand %p823_p0, %p822_p13 }
  0x2f   : > { %p825_p5 = pneg %p824_p2 }
  0x31   : > { %p830_p9 = pnand %p828_p7, %p825_p5 }
  0x33   : > { %833 = shalt.err (!%p830_p9)
}
  0x34   : > { %s1042_s8 = smov [#allocation3]   ;;  %p40_p11 = scmp.ge.s32.totalorder %s39_s22, 3 }
  0x35   : > { %696 = dma.hbm_to_smem (!%p694_p12), %s1516_s0, 16, %s1042_s8, [#allocation6]  }
  0x36   : > { %s42_s7 = sadd.s32 1, %s1032_s11  ;;  %s46_s24 = sadd.s32 1, %s1036_s12 }
  0x37   : > { %s1568_s22 = smov (%p40_p11, %s39_s22), 0  ;;  %s1570_s7 = smov (!%p40_p11, %s42_s7), %s1032_s11 }
  0x38   : > { %1517 = sst [smem:[#allocation25_spill]] %s1568_s22  ;;  %s72_s6 = ssub.s32 %s1028_s10, %s1568_s22 }
  0x39   : > { %p85_p13 = scmp.ne.s32.totalorder %s1012_s29, %s1008_s28  ;;  %p44_p0 = scmp.ge.s32.totalorder %s1570_s7, 2 }
  0x3a   : > { %p1487_p2 = scmp.eq.s32.totalorder %s1040_s13, 0  ;;  %p1488_p5 = scmp.lt.s32.totalorder %s1040_s13, 12 }
  0x3b   : > { %s280_s9 = sand.u32 1, %s1012_s29   ;;  %s1572_s7 = smov (%p44_p0, %s1570_s7), 0 }
  0x3c   : > { %1518 = sst [smem:[#allocation26_spill]] %s1572_s7  ;;  %s1574_s24 = smov (!%p44_p0, %s46_s24), %s1036_s12 }
  0x3d   : > { %s74_s8 = ssub.s32 %s1032_s11, %s1572_s7  ;;  %p1221_p12 = por %p1487_p2, %p85_p13 }
  0x3e   : > { %p48_p7 = scmp.ge.s32.totalorder %s1574_s24, 2  ;;  %s658_s27 = sshll.u32 %s280_s9, 3 }
  0x3f   : > { %s659_s14 = sshll.u32 %s1028_s10, 1  ;;  %s682_s0 = smul.u32 6, %s1036_s12 }
  0x40   : > { %s1576_s24 = smov (%p48_p7, %s1574_s24), 0  ;;  %s289_s15 = sadd.s32 %s1032_s11, %s659_s14 }
  0x41   : > { %1520 = sst [smem:[#allocation27_spill]] %s1576_s24  ;;  %s71_s20 = ssub.s32 %s1036_s12, %s1576_s24 }
  0x42   : > { %s73_s7 = sor.u32 %s72_s6, %s71_s20  ;;  %s103_s22 = sor.u32 %s74_s8, %s71_s20 }
  0x43   : > { %s75_s5 = sor.u32 %s74_s8, %s73_s7  ;;  %p1232_p9 = scmp.eq.s32.totalorder %s103_s22, 0 }
  0x44   : > { %p76_p11 = scmp.eq.s32.totalorder %s75_s5, 0  ;;  %s291_s3 = sadd.s32 %s682_s0, %s289_s15 }
  0x45   : > { %s660_s10 = sshll.u32 %s291_s3, 7  ;;  %s284_s30 = scalar_lea.vmem [#allocation7], %s658_s27 }
  0x46   : > { %s295_s19 = sshll.u32 %s284_s30, 4  ;;  %s1522_s18 = sadd.s32 1, %s1012_s29  ;;  %s1246_s19 = int_to_ptr.vmem [resolvable:$true] %s295_s19 }
  0x47   : > { %s1239_s28 = scalar_select %p76_p11, %s1012_s29, %s1522_s18  }
  0x48   : > { %s1244_s24 = scalar_lea.hbm %s1465_s1, %s660_s10  ;;  %p1252_p13 = pnand %p1488_p5, %p1221_p12 }
  0x49   : > { %s662_s3 = sshll.u32 %s1036_s12, 1  ;;  %s106_s5 = sadd.s32 1, %s1000_s26 }
  0x4a   : > { %s281_s30 = scalar_lea.sflag [#allocation4], %s280_s9  ;;  %s834_s16 = scalar_lea.hbm %s1244_s24, 128 }
  0x4b   : > { %p835_p0 = scmp.ne.s32.totalorder %s1244_s24, %s834_s16  ;;  %p836_p7 = pneg %p1252_p13 }
  0x4c   : > { %s839_s22 = scalar_lea.hbm %s1465_s1, 1536  ;;  %p840_p12 = scmp.lt.u32.totalorder %s1244_s24, %s1465_s1 }
  0x4d   : > { %p837_p11 = pnand %p836_p7, %p835_p0  ;;  %p841_p5 = scmp.lt.u32.totalorder %s839_s22, %s834_s16 }
  0x4e   : > { %p843_p6 = scmp.lt.u32.totalorder %s834_s16, %s1244_s24 }
  0x4f   : > { %p838_p2 = pneg %p837_p11  ;;  %p842_p8 = por %p841_p5, %p840_p12 }
  0x51   : > { %p844_p4 = por %p843_p6, %p842_p8 }
  0x53   : > { %p845_p1 = pnand %p844_p4, %p838_p2 }
  0x55   : > { %848 = shalt.err (!%p845_p1)
}
  0x56   : > { %s849_s6 = scalar_lea.vmem %s1246_s19, 128  ;;  %s1043_s9 = smov [#allocation7]  }
  0x57   : > { %p850_p0 = scmp.ne.s32.totalorder %s1246_s19, %s849_s6  ;;  %s854_s8 = sshll.u32 %s1043_s9, 4  ;;  %s855_s8 = int_to_ptr.vmem [resolvable:$false] %s854_s8 }
  0x58   : > { %s856_s23 = scalar_lea.vmem %s855_s8, 256  ;;  %p857_p3 = scmp.lt.s32.totalorder %s1246_s19, %s855_s8 }
  0x59   : > { %p852_p11 = pnand %p850_p0, %p836_p7  ;;  %p858_p5 = scmp.lt.s32.totalorder %s856_s23, %s849_s6 }
  0x5b   : > { %p853_p10 = pneg %p852_p11  ;;  %p859_p12 = por %p858_p5, %p857_p3 }
  0x5d   : > { %p860_p6 = pnand %p859_p12, %p853_p10 }
  0x5f   : > { %863 = shalt.err (!%p860_p6)
}
  0x60   : > { %700 = dma.hbm_to_vmem [thread:$0]  (!%p1252_p13), %s1244_s24, 128, %s1246_s19, %s281_s30  }
  0x61   : > { %s1288_s27 = scalar_select %p1232_p9, %s1000_s26, %s106_s5  }
  0x62   : > { %p113_p1 = scmp.ne.s32.totalorder %s1000_s26, %s996_s25  ;;  %s302_s15 = sand.u32 1, %s1000_s26  }
  0x63   : > { %s661_s14 = sshll.u32 %s302_s15, 3  ;;  %p1524_p3 = scmp.eq.s32.totalorder %s1040_s13, 0 }
  0x64   : > { %p1525_p8 = scmp.ne.s32.totalorder %s1508_s17, 0  ;;  %s311_s16 = sadd.s32 %s1032_s11, %s662_s3 }
  0x65   : > { %p115_p4 = por %p113_p1, %p1524_p3  ;;  %s663_s10 = sshll.u32 %s311_s16, 7 }
  0x66   : > { %p1297_p10 = por %p1525_p8, %p113_p1  ;;  %s306_s18 = scalar_lea.vmem [#allocation8], %s661_s14 }
  0x67   : > { %s315_s22 = sshll.u32 %s306_s18, 4  ;;  %s1307_s4 = scalar_lea.hbm %s1466_s2, %s663_s10  ;;  %s1309_s22 = int_to_ptr.vmem [resolvable:$true] %s315_s22 }
  0x68   : > { %p1527_p2 = scmp.lt.s32.totalorder %s1040_s13, 12  ;;  %s303_s3 = scalar_lea.sflag [#allocation9], %s302_s15 }
  0x69   : > { %s864_s5 = scalar_lea.hbm %s1307_s4, 128  ;;  %s869_s20 = scalar_lea.hbm %s1466_s2, 512 }
  0x6a   : > { %p1313_p9 = pnand %p1527_p2, %p115_p4  ;;  %p865_p13 = scmp.ne.s32.totalorder %s1307_s4, %s864_s5 }
  0x6b   : > { %p870_p5 = scmp.lt.u32.totalorder %s1307_s4, %s1466_s2  ;;  %p871_p12 = scmp.lt.u32.totalorder %s869_s20, %s864_s5 }
  0x6c   : > { %p866_p7 = pneg %p1313_p9  ;;  %p873_p1 = scmp.lt.u32.totalorder %s864_s5, %s1307_s4 }
  0x6d   : > { %p872_p6 = por %p871_p12, %p870_p5 }
  0x6e   : > { %p867_p0 = pnand %p866_p7, %p865_p13 }
  0x6f   : > { %p874_p3 = por %p873_p1, %p872_p6 }
  0x70   : > { %p868_p11 = pneg %p867_p0 }
  0x72   : > { %p875_p4 = pnand %p874_p3, %p868_p11 }
  0x74   : > { %878 = shalt.err (!%p875_p4)
}
  0x75   : > { %s879_s8 = scalar_lea.vmem %s1309_s22, 128  ;;  %s1044_s23 = smov [#allocation8]  }
  0x76   : > { %p880_p8 = scmp.ne.s32.totalorder %s1309_s22, %s879_s8  ;;  %s884_s15 = sshll.u32 %s1044_s23, 4  ;;  %s885_s15 = int_to_ptr.vmem [resolvable:$false] %s884_s15 }
  0x77   : > { %s886_s14 = scalar_lea.vmem %s885_s15, 256  ;;  %p887_p0 = scmp.lt.s32.totalorder %s1309_s22, %s885_s15 }
  0x78   : > { %p882_p2 = pnand %p880_p8, %p866_p7  ;;  %p888_p5 = scmp.lt.s32.totalorder %s886_s14, %s879_s8 }
  0x7a   : > { %p883_p13 = pneg %p882_p2  ;;  %p889_p12 = por %p888_p5, %p887_p0 }
  0x7c   : > { %p890_p6 = pnand %p889_p12, %p883_p13 }
  0x7e   : > { %893 = shalt.err (!%p890_p6)
}
  0x7f   : > { %703 = dma.hbm_to_vmem [thread:$0]  (!%p1313_p9), %s1307_s4, 128, %s1309_s22, %s303_s3  }
  0x80   : > { %p1529_p11 = scmp.ne.s32.totalorder %s1515_s21, 0 }
  0x81   : > { %s1530_s16 = sld [smem:[#allocation21_spill]] (!%p1529_p11) }
  0x82   : > { %336 = sbr.rel (%p1529_p11) target bundleno = 556 (0x22c), region = 48 }
  0x87   : > { %p1531_p7 = scmp.ne.s32.totalorder (!%p1529_p11), %s1530_s16, 0 }
  0x89   : > { %975 = dma.done.wait (%p1531_p7), [#allocation6], 16  }
  0x8a   : > { %977 = vsyncadd (%p1531_p7), [#allocation6], 4294967280  ;;  %s1532_s10 = sld [smem:[#allocation16_spill]]  ;;  %s1533_s18 = sld [smem:[#allocation22_spill]] }
  0x90   : > { %s342_s19 = sand.u32 1, %s1532_s10   ;;  %p1534_p1 = scmp.ne.s32.totalorder %s1533_s18, 0 }
  0x91   : > { %s666_s24 = sshll.u32 %s342_s19, 3  ;;  %s343_s5 = scalar_lea.sflag [#allocation4], %s342_s19 }
  0x92   : > { %s346_s30 = scalar_lea.vmem [#allocation7], %s666_s24 }
  0x93   : > { %979 = dma.done.wait (%p1534_p1), %s343_s5, 128  }
  0x94   : > { %981 = vsyncadd (%p1534_p1), %s343_s5, 4294967168  ;;  %s1535_s21 = sld [smem:[#allocation23_spill]]  ;;  %s1354_s22 = sand.u32 1, %s996_s25  }
  0x95   : > { %s667_s4 = sshll.u32 %s1354_s22, 3  ;;  %s352_s17 = scalar_lea.sflag [#allocation9], %s1354_s22 }
  0x96   : > { %s1360_s3 = scalar_lea.vmem [#allocation8], %s667_s4 }
  0x9a   : > { %p1536_p9 = scmp.ne.s32.totalorder %s1535_s21, 0 }
  0x9c   : > { %983 = dma.done.wait (%p1536_p9), %s352_s17, 128  }
  0x9d   : > { %985 = vsyncadd (%p1536_p9), %s352_s17, 4294967168 }
  0x9e   : > { %360 = sfence }
  0x9f   : > { %v404_v0 = vld [vmem:[%s346_s30] sm:$0xff]  ;;  %s1537_s7 = sld [smem:[#allocation17_spill]]  ;;  %s1538_s23 = sld [smem:[#allocation29_spill]] }
  0xa0   : > { %407 = vadd.xlane.f32.xlu0 %v404_v0  ;;  %v409_v1 = vmul.f32 %v404_v0, %v404_v0  ;;  %s1539_s10 = sld [smem:[#allocation30_spill]]  ;;  %s1377_s19 = scalar_lea.vmem [#allocation10], %s667_s4 }
  0xa4   : > { %410 = vadd.xlane.f32.xlu0 %v409_v1 }
  0xa5   : > { %p398_p3 = scmp.lt.s32.totalorder %s1537_s7, 2  ;;  %s434_s6 = sld [smem:[#allocation3 + %s1537_s7]] }
  0xa6   : > { %p671_p4 = scmp.ne.s32.totalorder %s1537_s7, 0 }
  0xa7   : > { %s399_s20 = scalar_select %p398_p3, %s1537_s7, 2 }
  0xa9   : > { %s400_s15 = scalar_lea.vmem %s1538_s23, %s399_s20  ;;  %s403_s18 = scalar_lea.vmem %s1539_s10, %s399_s20 }
  0xaa   : > { %v669_v11 = vld [vmem:[%s400_s15] ss:$0 sm:$0xff] }
  0xab   : > { %v670_v13 = vld [vmem:[%s403_s18] ss:$0 sm:$0xff]  ;;  %v435_v15 = vstv %s434_s6 }
 0x12d   : > { %v408_v2 = vpop.xlane.xlu0 %407 }
 0x12e   : > { %v412_v3 = vmul.f32 0.0078125, %v408_v2 }
 0x130   : > { %v414_v5 = vmul.f32 %v412_v3, %v412_v3  ;;  %v416_v9 = vsub.f32 %v404_v0, %v412_v3 }
 0x131   : > { %v411_v4 = vpop.xlane.xlu0 %410 }
 0x132   : > { %v413_v6 = vmul.f32 0.0078125, %v411_v4 }
 0x134   : > { %v415_v7 = vsub.f32 %v413_v6, %v414_v5 }
 0x136   : > { %v417_v8 = vadd.f32 1e-05, %v415_v7 }
 0x138   : > { %817 = vrsqrt.f32 %v417_v8 }
 0x142   : > { %v818_v10 = vpop.eup %817 }
 0x143   : > { %v419_v12 = vmul.f32 %v818_v10, %v416_v9  ;;  %440 = sbr.rel (%p671_p4) target bundleno = 332 (0x14c), region = 64 }
 0x145   : > { %v426_v14 = vmul.f32 %v669_v11, %v419_v12 }
 0x147   : > { %v433_v16 = vadd.f32 %v670_v13, %v426_v14 }
 0x149   : > { %v436_v17 = vmul.f32 %v435_v15, %v433_v16 }
 0x14b   : > { %441 = vst [vmem:[#allocation2] sm:$0xff] %v436_v17 }
 0x14c PF: > { %s1540_s24 = sld [smem:[#allocation17_spill]] }
 0x152   : > { %p672_p8 = scmp.le.s32.totalorder %s1540_s24, 0 }
 0x153   : > { %v446_v18 = vld [vmem:[#allocation2] sm:$0xff] (!%p672_p8) }
 0x154   : > { %445 = sbr.rel (%p672_p8) target bundleno = 347 (0x15b), region = 68  ;;  %v447_v19 = vadd.f32 (!%p672_p8), %v446_v18, %v436_v17 }
 0x156   : > { %448 = vst [vmem:[#allocation2] sm:$0xff] (!%p672_p8), %v447_v19 }
 0x15b PF: > { %s1541_s5 = sld [smem:[#allocation17_spill]] }
 0x161   : > { %p673_p2 = scmp.ne.s32.totalorder %s1541_s5, 2 }
 0x162   : > { %v453_v20 = vld [vmem:[%s1360_s3] sm:$0xff] (!%p673_p2)  ;;  %s676_s30 = sld [smem:[#allocation3 + $0x3]] (!%p673_p2)  ;;  %s1542_s17 = sld [smem:[#allocation31_spill]] (!%p673_p2) }
 0x163   : > { %452 = sbr.rel (%p673_p2) target bundleno = 529 (0x211), region = 72  ;;  %456 = vadd.xlane.f32.xlu0 (!%p673_p2), %v453_v20  ;;  %v458_v21 = vmul.f32 (!%p673_p2), %v453_v20, %v453_v20  ;;  %s1543_s20 = sld [smem:[#allocation32_spill]] (!%p673_p2)  ;;  %v484_v37 = vld [vmem:[#allocation2] sm:$0xff] (!%p673_p2) }
 0x167   : > { %459 = vadd.xlane.f32.xlu0 (!%p673_p2), %v458_v21 }
 0x168   : > { %v674_v31 = vld [vmem:[%s1542_s17] ss:$0 sm:$0xff] (!%p673_p2)  ;;  %v485_v35 = vstv (!%p673_p2), %s676_s30 }
 0x169   : > { %v675_v33 = vld [vmem:[%s1543_s20] ss:$0 sm:$0xff] (!%p673_p2) }
 0x1f0   : > { %v457_v22 = vpop.xlane.xlu0 %456 }
 0x1f1   : > { %v461_v23 = vmul.f32 0.0078125, %v457_v22 }
 0x1f3   : > { %v463_v25 = vmul.f32 %v461_v23, %v461_v23  ;;  %v465_v29 = vsub.f32 %v453_v20, %v461_v23 }
 0x1f4   : > { %v460_v24 = vpop.xlane.xlu0 %459 }
 0x1f5   : > { %v462_v26 = vmul.f32 0.0078125, %v460_v24 }
 0x1f7   : > { %v464_v27 = vsub.f32 %v462_v26, %v463_v25 }
 0x1f9   : > { %v466_v28 = vadd.f32 1e-05, %v464_v27 }
 0x1fb   : > { %819 = vrsqrt.f32 %v466_v28 }
 0x205   : > { %v820_v30 = vpop.eup %819 }
 0x206   : > { %v468_v32 = vmul.f32 %v820_v30, %v465_v29 }
 0x208   : > { %v475_v34 = vmul.f32 %v674_v31, %v468_v32 }
 0x20a   : > { %v482_v36 = vadd.f32 %v675_v33, %v475_v34 }
 0x20c   : > { %v486_v38 = vmul.f32 %v485_v35, %v482_v36 }
 0x20e   : > { %v487_v39 = vadd.f32 %v486_v38, %v484_v37 }
 0x210   : > { %488 = vst [vmem:[%s1377_s19] sm:$0xff] %v487_v39 }
 0x211 PF: > { %s1544_s6 = sld [smem:[#allocation19_spill]]  ;;  %s1545_s9 = sld [smem:[#allocation18_spill]] }
 0x212   : > { %s505_s15 = sshll.u32 %s1377_s19, 4  ;;  %s1546_s18 = sld [smem:[#allocation33_spill]]  ;;  %s1393_s15 = int_to_ptr.vmem [resolvable:$true] %s505_s15 }
 0x213   : > { %s490_s5 = scalar_lea.sflag [#allocation5], %s1354_s22  ;;  %s894_s30 = scalar_lea.vmem %s1393_s15, 128 }
 0x214   : > { %p895_p13 = scmp.ne.s32.totalorder %s1393_s15, %s894_s30  ;;  %s1045_s21 = smov [#allocation10]  }
 0x215   : > { %s898_s4 = sshll.u32 %s1045_s21, 4  ;;  %s899_s4 = int_to_ptr.vmem [resolvable:$false] %s898_s4 }
 0x216   : > { %p896_p0 = pnand %p895_p13, %p1297_p10  ;;  %s900_s19 = scalar_lea.vmem %s899_s4, 256 }
 0x217   : > { %s678_s8 = sshll.u32 %s1544_s6, 1  ;;  %p901_p12 = scmp.lt.s32.totalorder %s1393_s15, %s899_s4 }
 0x218   : > { %s501_s23 = sadd.s32 %s1545_s9, %s678_s8  ;;  %p897_p5 = pneg %p896_p0 }
 0x219   : > { %s679_s14 = sshll.u32 %s501_s23, 7  ;;  %p902_p6 = scmp.lt.s32.totalorder %s900_s19, %s894_s30 }
 0x21a   : > { %s503_s24 = scalar_lea.hbm %s1546_s18, %s679_s14 }
 0x21b   : > { %p903_p11 = por %p902_p6, %p901_p12 }
 0x21d   : > { %p904_p7 = pnand %p903_p11, %p897_p5 }
 0x21f   : > { %907 = shalt.err (!%p904_p7)
}
 0x220   : > { %s908_s17 = scalar_lea.hbm %s503_s24, 128  ;;  %s912_s7 = scalar_lea.hbm %s1546_s18, 512 }
 0x221   : > { %p909_p1 = scmp.ne.s32.totalorder %s503_s24, %s908_s17  ;;  %p913_p4 = scmp.lt.u32.totalorder %s503_s24, %s1546_s18 }
 0x222   : > { %p914_p8 = scmp.lt.u32.totalorder %s912_s7, %s908_s17  ;;  %p916_p13 = scmp.lt.u32.totalorder %s908_s17, %s503_s24 }
 0x223   : > { %p910_p9 = pnand %p909_p1, %p1297_p10 }
 0x224   : > { %p915_p2 = por %p914_p8, %p913_p4 }
 0x225   : > { %p911_p3 = pneg %p910_p9 }
 0x226   : > { %p917_p0 = por %p916_p13, %p915_p2 }
 0x228   : > { %p918_p5 = pnand %p917_p0, %p911_p3 }
 0x22a   : > { %921 = shalt.err (!%p918_p5)
}
 0x22b   : > { %691 = dma.vmem_to_hbm [thread:$0]  (%p1297_p10), %s1393_s15, 128, %s503_s24, %s490_s5  }
 0x22c PF: > { %s1547_s9 = sld [smem:[#allocation15_spill]]  ;;  %s1548_s8 = sld [smem:[#allocation24_spill]] }
 0x22d   : > { %p711_p12 = scmp.ge.s32.totalorder %s1040_s13, 2 }
 0x232   : > { %s517_s23 = sand.u32 1, %s1547_s9   ;;  %p1549_p6 = scmp.ne.s32.totalorder %s1548_s8, 0 }
 0x233   : > { %s518_s14 = scalar_lea.sflag [#allocation5], %s517_s23 }
 0x234   : > { %p705_p11 = pnand %p711_p12, %p1549_p6 }
 0x236   : > { %987 = dma.done.wait (!%p705_p11), %s518_s14, 128  }
 0x237   : > { %989 = vsyncadd (!%p705_p11), %s518_s14, 4294967168  ;;  %s27_s13 = sadd.s32 1, %s1040_s13   ;;  %s1551_s0 = sld [smem:[#allocation16_spill]] }
 0x238   : > { %p1420_p7 = scmp.ge.s32.totalorder %s27_s13, 14   ;;  %s1552_s15 = smov %s1239_s28 }
 0x239   : > { %s1553_s30 = sld [smem:[#allocation20_spill]]  ;;  %s1554_s10 = sld [smem:[#allocation25_spill]] }
 0x23a   : > { %s1555_s5 = sld [smem:[#allocation26_spill]]  ;;  %s1556_s21 = sld [smem:[#allocation27_spill]] }
 0x23b   : > { %s1557_s24 = smov %s996_s25  ;;  %s1558_s25 = smov %s1000_s26 }
 0x23c   : > { %s1559_s26 = smov %s1288_s27  ;;  %s1561_s28 = smov %s1012_s29 }
 0x23d   : > { %s1560_s27 = smov %s1551_s0  ;;  %s1562_s29 = smov %s1552_s15 }
 0x23e   : > { %s1563_s8 = smov %s1032_s11  ;;  %s1564_s9 = smov %s1036_s12 }
 0x23f   :  { %26 = sbr.rel (!%p1420_p7) target bundleno = 20 (0x14), region = 129 }
 0x240   : > { %s1565_s11 = smov %s1555_s5  ;;  %s1566_s12 = smov %s1556_s21 }
 0x246   :  { %523 = vsyncpa [#allocation4], 1 }
 0x247   :  { %525 = vsyncpa [#allocation4 + $0x1], 1 }
 0x248   :  { %526 = vsyncpa [#allocation9], 1 }
 0x249   :  { %528 = vsyncpa [#allocation9 + $0x1], 1 }
 0x24a   :  { %529 = vsyncpa [#allocation5], 1 }
 0x24b   :  { %531 = vsyncpa [#allocation5 + $0x1], 1 }
 0x24c   :  { %532 = vsyncpa [#allocation6], 1 }
 0x24d   :  { %534 = vsyncpa [#allocation6 + $0x1], 1 }

</bundles_post_ra>
